<compile_context>
chip_gen: v6e
topology: v6e:2x2x1
jax: 0.10.0
libtpu: 0.0.40
codegen_flags: <defaults>
</compile_context>

<pallas_src>
import jax
import jax.numpy as jnp
from jax.experimental import pallas as pl
from jax.experimental.pallas import tpu as pltpu


def _capsdim_kernel(x_ref, w_ref, b_ref, o_ref):
    # (tile, Kp) @ (Kp, Mp) on the MXU, f32 accumulation, f32 bias row, cast on store.
    acc = jnp.dot(x_ref[...], w_ref[...], preferred_element_type=jnp.float32)
    o_ref[...] = (acc + b_ref[...]).astype(o_ref.dtype)


def _default_target_lanes():
    """256-lane packing for the 2x256^2 MXUs (v6e/v7x); 128 for v5e's 4x128^2."""
    try:
        kind = jax.devices()[0].device_kind.lower()
    except Exception:
        return 256
    if "v5e" in kind or "v5 lite" in kind or "v5lite" in kind:
        return 128
    return 256


def _choose_pack(k_small, m_small, target_lanes):
    """Largest power-of-two row-pack factor p with p*k and p*m lane-aligned."""
    best, p = 1, 1
    while p * max(k_small, m_small) <= target_lanes:
        if (p * k_small) % 128 == 0 and (p * m_small) % 128 == 0:
            best = p
        p *= 2
    if best == 1:  # fall back: at least make the output lane-dense
        p = 1
        while p * m_small <= target_lanes:
            if (p * m_small) % 128 == 0:
                best = p
            p *= 2
    return best


def _round_up(x, m):
    return ((x + m - 1) // m) * m


def _choose_tile(n_rows, tile_rows, min_grid_steps=4):
    """Sublane-aligned tile: large (amortizes per-step overhead) but leaves
    >= min_grid_steps grid steps when possible (v7x has 2 TensorCores)."""
    if n_rows <= 8:
        return n_rows                       # block == full array dim (allowed)
    per_step = _round_up(pl.cdiv(n_rows, min_grid_steps), 8)
    return max(8, min(tile_rows, per_step))


def p4_conv_p4_1x1(x_flat, w_blk, bias_blk, pack, *, tile_rows=2048,
                   out_dtype=None):
    """x_flat:   (N, k_small)                  activations (any float dtype)
       w_blk:    (pack*k_small, pack*m_small)  block-diag transformed filter (io dtype)
       bias_blk: (1, pack*m_small) f32         bias row
       returns   (N, m_small) in out_dtype."""
    n, k_small = x_flat.shape
    kp, mp = w_blk.shape
    m_small = mp // pack
    io_dtype = w_blk.dtype
    if out_dtype is None:
        out_dtype = io_dtype

    n_main = (n // pack) * pack
    pieces = []

    if n_main > 0:
        x_main = x_flat if n_main == n else x_flat[:n_main]
        # bf16 streaming; under jit this cast fuses into the upstream producer.
        if x_main.dtype != io_dtype:
            x_main = x_main.astype(io_dtype)
        n_rows = n_main // pack
        xp = x_main.reshape(n_rows, kp)

        tile = _choose_tile(n_rows, tile_rows)
        grid = (pl.cdiv(n_rows, tile),)

        isz_in = jnp.dtype(io_dtype).itemsize
        isz_out = jnp.dtype(out_dtype).itemsize
        in_blk_b = tile * kp * isz_in
        out_blk_b = tile * mp * isz_out
        w_b = kp * mp * isz_in
        vmem_limit = int(min(max(2 * (in_blk_b + out_blk_b) + 2 * w_b + (4 << 20),
                                 16 << 20), 40 << 20))
        cost = pl.CostEstimate(
            flops=2 * n_rows * kp * mp,          # actual MXU work on block-diag
            transcendentals=0,
            bytes_accessed=n_rows * (kp * isz_in + mp * isz_out)
                           + kp * mp * isz_in + mp * 4)

        y = pl.pallas_call(
            _capsdim_kernel,
            out_shape=jax.ShapeDtypeStruct((n_rows, mp), out_dtype),
            grid_spec=pltpu.PrefetchScalarGridSpec(
                num_scalar_prefetch=0,
                grid=grid,
                in_specs=[
                    pl.BlockSpec((tile, kp), lambda i: (i, 0)),  # packed X tile
                    pl.BlockSpec((kp, mp), lambda i: (0, 0)),    # resident weight
                    pl.BlockSpec((1, mp), lambda i: (0, 0)),     # f32 bias row
                ],
                out_specs=pl.BlockSpec((tile, mp), lambda i: (i, 0)),
            ),
            compiler_params=pltpu.CompilerParams(
                dimension_semantics=("parallel",),
                vmem_limit_bytes=vmem_limit),
            cost_estimate=cost,
        )(xp, w_blk, bias_blk)
        pieces.append(y.reshape(n_main, m_small))

    if n_main < n:
        # <= pack-1 leftover rows: tiny pure-JAX epilogue keeps the main
        # pallas_call free of host-side pad / output-slice HBM copies.
        x_rem = x_flat[n_main:].astype(io_dtype)
        w_small = w_blk[:k_small, :m_small]
        b_small = bias_blk[0, :m_small]
        y_rem = (jnp.dot(x_rem, w_small, preferred_element_type=jnp.float32)
                 + b_small).astype(out_dtype)
        pieces.append(y_rem)

    return pieces[0] if len(pieces) == 1 else jnp.concatenate(pieces, axis=0)


class CapsuleDimension:
    """JAX/Pallas port of the PyTorch CapsuleDimension module (P4ConvP4, 1x1)."""

    def __init__(self, in_dim, out_dim, key, *, target_lanes=None,
                 tile_rows=2048, io_dtype=jnp.bfloat16, out_dtype=jnp.bfloat16):
        self.in_dim = in_dim
        self.out_dim = out_dim
        self._tile_rows = tile_rows
        self._out_dtype = out_dtype
        kw, kb = jax.random.split(key)
        # P4ConvP4(in_dim, out_dim, 1) weight: (out, in, 4, 1, 1) kept as (out, in, 4).
        stdv = 1.0 / (in_dim * 4) ** 0.5
        self.weight = jax.random.uniform(
            kw, (out_dim, in_dim, 4), jnp.float32, -stdv, stdv)
        self.bias = jax.random.uniform(kb, (out_dim,), jnp.float32, -stdv, stdv)

        # One-time prep: p4 filter transform + lane-dense block-diagonal pack.
        if target_lanes is None:
            target_lanes = _default_target_lanes()
        k_small, m_small = in_dim * 4, out_dim * 4
        self._pack = _choose_pack(k_small, m_small, target_lanes)
        w_t = self._transformed_filter()                        # (k_small, m_small) f32
        self._w_blk = jnp.kron(jnp.eye(self._pack, dtype=w_t.dtype),
                               w_t).astype(io_dtype)            # streamed dtype
        bias_row = jnp.repeat(self.bias[:, None], 4, axis=1).reshape(1, -1)
        self._bias_blk = jnp.tile(bias_row, (1, self._pack))    # (1, pack*m_small) f32

    def _transformed_filter(self):
        # p4 group-conv filter transform for a 1x1 kernel: output rotation r,
        # input-group channel s reads the base filter at (s - r) % 4.
        s = jnp.arange(4)[:, None]
        r = jnp.arange(4)[None, :]
        g = (s - r) % 4                                   # (s, r)
        w_rot = self.weight[:, :, g]                      # (out, in, s, r)
        w_t = jnp.transpose(w_rot, (1, 2, 0, 3))          # (in, s, out, r)
        return w_t.reshape(self.in_dim * 4, self.out_dim * 4)

    def __call__(self, capsule):
        # capsule: (B, num_capsule, in_dim, 4)
        num_capsule = capsule.shape[1]
        # torch: capsule.view(-1, in_dim, 4, 1, 1)
        x_flat = capsule.reshape(-1, self.in_dim * 4)
        y = p4_conv_p4_1x1(x_flat, self._w_blk, self._bias_blk, self._pack,
                           tile_rows=self._tile_rows,
                           out_dtype=self._out_dtype)      # (N, out_dim*4)
        # conv output is (N, out_dim, 4, 1, 1); torch then does view(-1, num_capsule, 4, 1)
        return y.reshape(-1, num_capsule, 4, 1)


if __name__ == "__main__":
    B, NUM_CAPSULE, IN_DIM, OUT_DIM = 2, 8, 8, 8

    key = jax.random.PRNGKey(0)
    k_in, k_mod = jax.random.split(key)
    capsule = jax.random.normal(k_in, (B, NUM_CAPSULE, IN_DIM, 4), jnp.float32)

    mod = CapsuleDimension(IN_DIM, OUT_DIM, k_mod)
    out = mod(capsule)
    out = jax.block_until_ready(out)

    # Pure-JAX f32 reference of the same p4 group conv, for self-check.
    s = jnp.arange(4)[:, None]
    r = jnp.arange(4)[None, :]
    w_rot = mod.weight[:, :, (s - r) % 4]                          # (o, i, s, r)
    x = capsule.reshape(-1, IN_DIM, 4)                             # (N, i, s)
    y_ref = jnp.einsum("nis,oisr->nor", x, w_rot) + mod.bias[None, :, None]
    y_ref = y_ref.reshape(-1, NUM_CAPSULE, 4, 1)

    assert out.shape == (B * OUT_DIM, NUM_CAPSULE, 4, 1), out.shape
    # bf16-streamed operands + bf16 output vs f32 reference -> ~3 decimal digits.
    assert jnp.allclose(out.astype(jnp.float32), y_ref, atol=5e-2, rtol=5e-2)
    print("KERNEL_OK")
</pallas_src>

<mosaic_0001>
module attributes {stable_mosaic.version = 11 : i64} {
  func.func @_capsdim_kernel(%arg0: i32, %arg1: memref<2x256xbf16, #tpu.memory_space<vmem>>, %arg2: memref<256x256xbf16, #tpu.memory_space<vmem>>, %arg3: memref<1x256xf32, #tpu.memory_space<vmem>>, %arg4: memref<2x256xbf16, #tpu.memory_space<vmem>>) attributes {dimension_semantics = [#tpu.dimension_semantics<parallel>], iteration_bounds = array<i64: 1>, scalar_prefetch = 0 : i64, scratch_operands = 0 : i64, tpu.core_type = #tpu.core_type<tc>, window_params = [{transform_indices = @transform_0, window_bounds = array<i64: 2, 256>}, {pipeline_mode = #tpu.pipeline_mode<synchronous>, transform_indices = @transform_1, window_bounds = array<i64: 256, 256>}, {pipeline_mode = #tpu.pipeline_mode<synchronous>, transform_indices = @transform_2, window_bounds = array<i64: 1, 256>}, {transform_indices = @transform_3, window_bounds = array<i64: 2, 256>}]} {
    %c0 = arith.constant 0 : index
    %c0_0 = arith.constant 0 : index
    %0 = vector.load %arg1[%c0, %c0_0] : memref<2x256xbf16, #tpu.memory_space<vmem>>, vector<2x256xbf16>
    %c0_1 = arith.constant 0 : index
    %c0_2 = arith.constant 0 : index
    %1 = vector.load %arg2[%c0_1, %c0_2] : memref<256x256xbf16, #tpu.memory_space<vmem>>, vector<256x256xbf16>
    %cst = arith.constant dense<0.000000e+00> : vector<2x256xf32>
    %2 = tpu.matmul %0, %1, %cst {dimension_numbers = #tpu.dot_dimension_numbers<[1], [0], [0], [1], [0, 0, 1, 1], [], []>} : vector<2x256xbf16>, vector<256x256xbf16>, vector<2x256xf32> -> vector<2x256xf32>
    %c0_3 = arith.constant 0 : index
    %c0_4 = arith.constant 0 : index
    %3 = vector.load %arg3[%c0_3, %c0_4] : memref<1x256xf32, #tpu.memory_space<vmem>>, vector<1x256xf32>
    %4 = vector.broadcast %3 : vector<1x256xf32> to vector<2x256xf32>
    %5 = arith.addf %2, %4 : vector<2x256xf32>
    %6 = arith.truncf %5 : vector<2x256xf32> to vector<2x256xbf16>
    %c0_5 = arith.constant 0 : index
    %c0_6 = arith.constant 0 : index
    %7 = vector.load %arg4[%c0_5, %c0_6] : memref<2x256xbf16, #tpu.memory_space<vmem>>, vector<2x256xbf16>
    tpu.vector_store %arg4[%c0_5, %c0_6], %6 {strides = array<i32>} : memref<2x256xbf16, #tpu.memory_space<vmem>>, vector<2x256xbf16>,
    return
  }
  func.func @transform_0(%arg0: i32) -> (i32, i32) {
    %c0_i32 = arith.constant 0 : i32
    %c0_i32_0 = arith.constant 0 : i32
    return %arg0, %c0_i32 : i32, i32
  }
  func.func @transform_1(%arg0: i32) -> (i32, i32) {
    %c0_i32 = arith.constant 0 : i32
    %c0_i32_0 = arith.constant 0 : i32
    %c0_i32_1 = arith.constant 0 : i32
    return %c0_i32, %c0_i32_0 : i32, i32
  }
  func.func @transform_2(%arg0: i32) -> (i32, i32) {
    %c0_i32 = arith.constant 0 : i32
    %c0_i32_0 = arith.constant 0 : i32
    %c0_i32_1 = arith.constant 0 : i32
    return %c0_i32, %c0_i32_0 : i32, i32
  }
  func.func @transform_3(%arg0: i32) -> (i32, i32) {
    %c0_i32 = arith.constant 0 : i32
    %c0_i32_0 = arith.constant 0 : i32
    return %arg0, %c0_i32 : i32, i32
  }
}

</mosaic_0001>

<bundles_post_ra>
// kernel: tpu_custom_call.1
= control target key start
LH: loop header
LB: loop body
LE: loop exit
PB: predicated region body
PF: predicated region fallthrough
CT: control target
= control target key end

     0   :  { %8 = vsyncpa [#allocation3], 0  ;;  %s542_s0 = inlined_call_operand.hbm [shape: bf16[2,256], index: 0, kind: input, shape index: {}]   ;;  %s543_s1 = inlined_call_operand.hbm [shape: bf16[256,256], index: 1, kind: input, shape index: {}]   ;;  %s544_s2 = inlined_call_operand.vmem [shape: f32[1,256], index: 2, kind: input, shape index: {}]   ;;  %s545_s3 = inlined_call_operand.hbm [shape: bf16[2,256], index: 3, kind: output, shape index: {}]  }
   0x1   :  { %9 = vsyncpa [#allocation6], 0 }
   0x2   :  { %10 = vsyncpa [#allocation4], 0  ;;  %s504_s12 = smov [#allocation2]   ;;  %s505_s14 = smov [#allocation5]  }
   0x3   :  { %s17_s13 = sshll.u32 %s504_s12, 4  ;;  %s26_s15 = sshll.u32 %s505_s14, 4  ;;  %s18_s13 = int_to_ptr.vmem [resolvable:$true] %s17_s13  ;;  %s27_s15 = int_to_ptr.vmem [resolvable:$true] %s26_s15 }
   0x4   :  { %s446_s16 = scalar_lea.vmem %s18_s13, 32  ;;  %p451_p1 = scmp.lt.s32.totalorder %s18_s13, %s18_s13 }
   0x5   :  { %p447_p0 = scmp.ne.s32.totalorder %s18_s13, %s446_s16  ;;  %p452_p2 = scmp.lt.s32.totalorder %s446_s16, %s446_s16 }
   0x7   :  { %p453_p3 = por %p452_p2, %p451_p1 }
   0x9   :  { %p454_p4 = pnand %p453_p3, %p447_p0 }
   0xb   :  { %457 = shalt.err (!%p454_p4)
}
   0xc   :  { %20 = dma.hbm_to_vmem [thread:$0]  %s542_s0, 32, %s18_s13, [#allocation3]  }
   0xd   :  { %s466_s19 = scalar_lea.vmem %s27_s15, 4096  ;;  %p471_p6 = scmp.lt.s32.totalorder %s27_s15, %s27_s15 }
   0xe   :  { %p467_p5 = scmp.ne.s32.totalorder %s27_s15, %s466_s19  ;;  %p472_p7 = scmp.lt.s32.totalorder %s466_s19, %s466_s19 }
  0x10   :  { %p473_p8 = por %p472_p7, %p471_p6 }
  0x12   :  { %p474_p9 = pnand %p473_p8, %p467_p5 }
  0x14   :  { %477 = shalt.err (!%p474_p9)
}
  0x15   :  { %s506_s20 = smov 128   ;;  %s507_s21 = smov 8  }
  0x16   :  { %32 = dma.hbm_to_vmem [thread:$0]  %s543_s1, 4096, %s27_s15, [#allocation6], %s506_s20, %s506_s20, %s507_s21  }
  0x17   :  { %498 = dma.done.wait [#allocation3], 32  }
  0x18   :  { %499 = vsyncadd [#allocation3], 4294967264 }
  0x19   :  { %500 = dma.done.wait [#allocation6], 4096  }
  0x1a   :  { %501 = vsyncadd [#allocation6], 4294963200  ;;  %v390_v0 = vld [vmem:[#allocation5 + $0x74] ss:$8 sps:$4 sm:$0xff]   ;;  %v392_v1 = vld [vmem:[#allocation5 + $0x70] ss:$8 sps:$4 sm:$0xff]   ;;  %v76_v9 = vlaneseq }
  0x1b   :  { %271 = vmatprep.subr.bf16.mxu0 %v390_v0  ;;  %v393_v2 = vld [vmem:[#allocation5 + $0x64] ss:$8 sps:$4 sm:$0xff]   ;;  %v395_v3 = vld [vmem:[#allocation5 + $0x60] ss:$8 sps:$4 sm:$0xff]   ;;  %v396_v4 = vld [vmem:[#allocation5 + $0x54] ss:$8 sps:$4 sm:$0xff]  }
  0x1c   :  { %272 = vmatpush1.bf16.msra.mxu0 %v392_v1  ;;  %v398_v5 = vld [vmem:[#allocation5 + $0x50] ss:$8 sps:$4 sm:$0xff]   ;;  %v399_v6 = vld [vmem:[#allocation5 + $0x44] ss:$8 sps:$4 sm:$0xff]   ;;  %v401_v7 = vld [vmem:[#allocation5 + $0x40] ss:$8 sps:$4 sm:$0xff]  }
  0x1d   :  { %273 = vmatprep.subr.bf16.mxu0 %v393_v2  ;;  %v402_v8 = vld [vmem:[#allocation5 + $0x34] ss:$8 sps:$4 sm:$0xff]   ;;  %v508_v10 = vmov 1966171168   ;;  %v404_v12 = vld [vmem:[#allocation5 + $0x30] ss:$8 sps:$4 sm:$0xff]  }
  0x1e   :  { %v96_v11 = vunpack.c.l.s4 %v508_v10  ;;  %v405_v13 = vld [vmem:[#allocation5 + $0x24] ss:$8 sps:$4 sm:$0xff]   ;;  %v77_v14 = vshrl.u32 %v76_v9, 7  ;;  %v407_v16 = vld [vmem:[#allocation5 + $0x20] ss:$8 sps:$4 sm:$0xff]   ;;  %s509_s24 = smov [#allocation7]  }
  0x1f   :  { %v408_v17 = vld [vmem:[#allocation5 + $0x14] ss:$8 sps:$4 sm:$0xff]   ;;  %v410_v21 = vld [vmem:[#allocation5 + $0x10] ss:$8 sps:$4 sm:$0xff]   ;;  %v411_v22 = vld [vmem:[#allocation5 + $0x4] ss:$8 sps:$4 sm:$0xff]  }
  0x20   :  { %274 = vmatpush1.bf16.msra.mxu0 %v395_v3  ;;  %v97_v15 = vunpack.c.0.s8 %v96_v11  ;;  %v349_v19 = vld.sshfl [vmem:[#allocation2] sm:$0x11 pattern:$0x75316420]  ;;  %v413_v24 = vld [vmem:[#allocation5] ss:$8 sps:$4 sm:$0xff]  }
  0x21   :  { %275 = vmatprep.subr.bf16.mxu0 %v396_v4  ;;  %v94_v20 = vcombine.high %v349_v19, %v349_v19  ;;  %v414_v25 = vld [vmem:[#allocation5 + $0xf4] ss:$8 sps:$4 sm:$0xff]   ;;  %v416_v26 = vld [vmem:[#allocation5 + $0xf0] ss:$8 sps:$4 sm:$0xff]   ;;  %v417_v27 = vld [vmem:[#allocation5 + $0xe4] ss:$8 sps:$4 sm:$0xff]  }
  0x22   :  { %v100_v18 = vsub.s32 %v97_v15, %v77_v14  ;;  %v419_v28 = vld [vmem:[#allocation5 + $0xe0] ss:$8 sps:$4 sm:$0xff]   ;;  %v420_v29 = vld [vmem:[#allocation5 + $0xd4] ss:$8 sps:$4 sm:$0xff]   ;;  %v422_v30 = vld [vmem:[#allocation5 + $0xd0] ss:$8 sps:$4 sm:$0xff]  }
  0x23   :  { %v423_v31 = vld [vmem:[#allocation5 + $0xc4] ss:$8 sps:$4 sm:$0xff]   ;;  %v425_v32 = vld [vmem:[#allocation5 + $0xc0] ss:$8 sps:$4 sm:$0xff]   ;;  %v426_v33 = vld [vmem:[#allocation5 + $0xb4] ss:$8 sps:$4 sm:$0xff]  }
  0x24   :  { %276 = vmatpush1.bf16.msra.mxu0 %v398_v5  ;;  %v108_v23 = vrot.slane %v94_v20, %v100_v18  ;;  %v428_v34 = vld [vmem:[#allocation5 + $0xb0] ss:$8 sps:$4 sm:$0xff]   ;;  %v429_v35 = vld [vmem:[#allocation5 + $0xa4] ss:$8 sps:$4 sm:$0xff]   ;;  %v431_v36 = vld [vmem:[#allocation5 + $0xa0] ss:$8 sps:$4 sm:$0xff]   ;;  %v101_v41 = vrot.slane %v349_v19, %v100_v18 }
  0x25   :  { %277 = vmatprep.subr.bf16.mxu0 %v399_v6  ;;  %v432_v37 = vld [vmem:[#allocation5 + $0x94] ss:$8 sps:$4 sm:$0xff]   ;;  %v434_v38 = vld [vmem:[#allocation5 + $0x90] ss:$8 sps:$4 sm:$0xff]   ;;  %v435_v39 = vld [vmem:[#allocation5 + $0x84] ss:$8 sps:$4 sm:$0xff]  }
  0x26   :  { %303 = vmatprep.mubr.bf16.mxu0 %v108_v23  ;;  %v437_v40 = vld [vmem:[#allocation5 + $0x80] ss:$8 sps:$4 sm:$0xff]   ;;  %v78_v42 = vsub.s32 0, %v77_v14  ;;  %v82_v43 = vsub.s32 1, %v77_v14  ;;  %v74_v44 = vld [vmem:[%s544_s2] sm:$0x3] }
  0x27   :  { %s339_s25 = sshll.u32 %s509_s24, 4  ;;  %s340_s25 = int_to_ptr.vmem [resolvable:$true] %s339_s25 }
  0x28   :  { %278 = vmatpush1.bf16.msra.mxu0 %v401_v7  ;;  %v79_v45 = vrot.slane %v74_v44, %v78_v42  ;;  %v83_v46 = vrot.slane %v74_v44, %v82_v43  ;;  %s478_s26 = scalar_lea.vmem %s340_s25, 32  ;;  %p483_p11 = scmp.lt.s32.totalorder %s340_s25, %s340_s25 }
  0x29   :  { %279 = vmatprep.subr.bf16.mxu0 %v402_v8  ;;  %p479_p10 = scmp.ne.s32.totalorder %s340_s25, %s478_s26  ;;  %p484_p12 = scmp.lt.s32.totalorder %s478_s26, %s478_s26 }
  0x2b   :  { %p485_p13 = por %p484_p12, %p483_p11 }
  0x2c   :  { %280 = vmatpush1.bf16.msra.mxu0 %v404_v12 }
  0x2d   :  { %281 = vmatprep.subr.bf16.mxu0 %v405_v13  ;;  %p486_p0 = pnand %p485_p13, %p479_p10 }
  0x30   :  { %282 = vmatpush1.bf16.msra.mxu0 %v407_v16 }
  0x31   :  { %283 = vmatprep.subr.bf16.mxu0 %v408_v17 }
  0x34   :  { %284 = vmatpush1.bf16.msra.mxu0 %v410_v21 }
  0x35   :  { %285 = vmatprep.subr.bf16.mxu0 %v411_v22 }
  0x38   :  { %286 = vmatpush1.bf16.msra.mxu0 %v413_v24 }
  0x39   :  { %287 = vmatprep.subr.bf16.mxu0 %v414_v25 }
  0x3c   :  { %288 = vmatpush2.bf16.msra.mxu0 %v416_v26 }
  0x3d   :  { %289 = vmatprep.subr.bf16.mxu0 %v417_v27 }
  0x40   :  { %290 = vmatpush2.bf16.msra.mxu0 %v419_v28 }
  0x41   :  { %291 = vmatprep.subr.bf16.mxu0 %v420_v29 }
  0x44   :  { %292 = vmatpush2.bf16.msra.mxu0 %v422_v30 }
  0x45   :  { %293 = vmatprep.subr.bf16.mxu0 %v423_v31 }
  0x48   :  { %294 = vmatpush2.bf16.msra.mxu0 %v425_v32 }
  0x49   :  { %295 = vmatprep.subr.bf16.mxu0 %v426_v33 }
  0x4c   :  { %296 = vmatpush2.bf16.msra.mxu0 %v428_v34 }
  0x4d   :  { %297 = vmatprep.subr.bf16.mxu0 %v429_v35 }
  0x50   :  { %298 = vmatpush2.bf16.msra.mxu0 %v431_v36 }
  0x51   :  { %299 = vmatprep.subr.bf16.mxu0 %v432_v37 }
  0x54   :  { %300 = vmatpush2.bf16.msra.mxu0 %v434_v38 }
  0x55   :  { %301 = vmatprep.subr.bf16.mxu0 %v435_v39 }
  0x58   :  { %302 = vmatpush2.bf16.msra.mxu0 %v437_v40 }
  0x5b   :  { %304 = vmatmul.mubr.bf16.vlgmr.msra.gmra.mxu0 %v101_v41 }
 0x11b   :  { %v305_v47 = vpop.f32.mrf.mxu0 }
 0x11c   :  { %v306_v49 = vadd.f32 %v305_v47, %v79_v45 }
 0x11d   :  { %v307_v48 = vpop.f32.mrf.mxu0 }
 0x11e   :  { %v308_v50 = vadd.f32 %v307_v48, %v83_v46 }
 0x11f   :  { %v309_v51 = vpop.f32.mrf.mxu0 }
 0x120   :  { %v382_v52 = vpack.c.bf16 %v308_v50, %v306_v49 }
 0x121   :  { %v310_v53 = vpop.f32.mrf.mxu0 }
 0x122   :  { %v323_v54 = vrot.slane %v382_v52, %v100_v18 }
 0x124   :  { %383 = vst.sshfl [vmem:[#allocation7] sm:$0x5 pattern:$0x73625140] %v323_v54 }
 0x125   :  { %489 = shalt.err (!%p486_p0)
}
 0x126   :  { %342 = dma.vmem_to_hbm [thread:$0]  %s340_s25, 32, %s545_s3, [#allocation4]  }
 0x127   :  { %502 = dma.done.wait [#allocation4], 32  }
 0x128   :  { %503 = vsyncadd [#allocation4], 4294967264 }
 0x129   :  { %346 = vsyncpa [#allocation3], 1 }
 0x12a   :  { %347 = vsyncpa [#allocation6], 1 }
 0x12b   :  { %348 = vsyncpa [#allocation4], 1 }

</bundles_post_ra>
